<compile_context>
chip_gen: v7x
topology: tpu7x:2x2x1
jax: 0.10.0
libtpu: 0.0.40
codegen_flags: <defaults>
</compile_context>

<pallas_src>
import functools

import jax
import jax.numpy as jnp
from jax.experimental import pallas as pl
from jax.experimental.pallas import tpu as pltpu


def _warp_kernel(x_ref, o_ref, *, scale: float):
    # Single elementwise multiply on an already lane-dense tile.
    x = x_ref[...]
    o_ref[...] = (x.astype(jnp.float32) * jnp.float32(scale)).astype(o_ref.dtype)


def uniform_box_warp(coordinates: jax.Array, sidelength: float,
                     *, lanes: int = 512, max_block_rows: int = 1024) -> jax.Array:
    """out = coordinates * (2 / sidelength), computed in a Pallas TPU kernel."""
    scale = 2.0 / float(sidelength)
    orig_shape = coordinates.shape
    dtype = coordinates.dtype
    total = int(coordinates.size)

    # ---- wrapper-side layout plumbing: flatten to a lane-dense (rows, lanes) slab ----
    flat = coordinates.reshape(-1)
    rows_needed = -(-total // lanes)                     # ceil-div
    if rows_needed <= max_block_rows:
        block_rows = rows_needed                         # single full-extent block
    else:
        block_rows = max_block_rows
    rows = -(-rows_needed // block_rows) * block_rows    # pad rows to a block multiple
    padded_total = rows * lanes
    pad = padded_total - total
    if pad:
        flat = jnp.pad(flat, (0, pad))
    x2d = flat.reshape(rows, lanes)

    grid = (rows // block_rows,)
    kernel = functools.partial(_warp_kernel, scale=scale)

    out2d = pl.pallas_call(
        kernel,
        out_shape=jax.ShapeDtypeStruct((rows, lanes), dtype),
        grid=grid,
        in_specs=[pl.BlockSpec((block_rows, lanes), lambda i: (i, 0))],
        out_specs=pl.BlockSpec((block_rows, lanes), lambda i: (i, 0)),
        input_output_aliases={0: 0},   # x2d is a wrapper-local intermediate -> safe to donate
        compiler_params=pltpu.CompilerParams(
            dimension_semantics=("parallel",),
        ),
    )(x2d)

    return out2d.reshape(-1)[:total].reshape(orig_shape)


if __name__ == "__main__":
    key = jax.random.PRNGKey(0)
    # Small, module-consistent shape: batch=2, num_points=128, coord_dim=3
    B, N, C = 2, 128, 3
    sidelength = 0.24  # static module "parameter" (scale_factor = 2 / sidelength)

    coordinates = jax.random.normal(key, (B, N, C), dtype=jnp.float32)

    out = uniform_box_warp(coordinates, sidelength)
    out = jax.block_until_ready(out)

    # Reference check (plain JAX)
    ref = coordinates * (2.0 / sidelength)
    assert out.shape == coordinates.shape
    assert out.dtype == coordinates.dtype
    assert jnp.allclose(out, ref, rtol=1e-6, atol=1e-6)

    print("KERNEL_OK")
</pallas_src>

<mosaic_0001>
module attributes {stable_mosaic.version = 11 : i64} {
  func.func @_warp_kernel(%arg0: i32, %arg1: memref<2x512xf32, #tpu.memory_space<vmem>>, %arg2: memref<2x512xf32, #tpu.memory_space<vmem>>) attributes {dimension_semantics = [#tpu.dimension_semantics<parallel>], iteration_bounds = array<i64: 1>, scalar_prefetch = 0 : i64, scratch_operands = 0 : i64, tpu.core_type = #tpu.core_type<tc>, window_params = [{transform_indices = @transform_0, window_bounds = array<i64: 2, 512>}, {transform_indices = @transform_1, window_bounds = array<i64: 2, 512>}]} {
    %c0 = arith.constant 0 : index
    %c0_0 = arith.constant 0 : index
    %0 = vector.load %arg1[%c0, %c0_0] : memref<2x512xf32, #tpu.memory_space<vmem>>, vector<2x512xf32>
    %cst = arith.constant 8.33333301 : f32
    %1 = vector.broadcast %cst : f32 to vector<2x512xf32>
    %2 = arith.mulf %0, %1 : vector<2x512xf32>
    %c0_1 = arith.constant 0 : index
    %c0_2 = arith.constant 0 : index
    %3 = vector.load %arg2[%c0_1, %c0_2] : memref<2x512xf32, #tpu.memory_space<vmem>>, vector<2x512xf32>
    tpu.vector_store %arg2[%c0_1, %c0_2], %2 {strides = array<i32>} : memref<2x512xf32, #tpu.memory_space<vmem>>, vector<2x512xf32>,
    return
  }
  func.func @transform_0(%arg0: i32) -> (i32, i32) {
    %c0_i32 = arith.constant 0 : i32
    %c0_i32_0 = arith.constant 0 : i32
    return %arg0, %c0_i32 : i32, i32
  }
  func.func @transform_1(%arg0: i32) -> (i32, i32) {
    %c0_i32 = arith.constant 0 : i32
    %c0_i32_0 = arith.constant 0 : i32
    return %arg0, %c0_i32 : i32, i32
  }
}

</mosaic_0001>

<bundles_post_ra>
// kernel: tpu_custom_call.1
= control target key start
LH: loop header
LB: loop body
LE: loop exit
PB: predicated region body
PF: predicated region fallthrough
CT: control target
= control target key end

     0   :  { %6 = vsyncpa [#allocation3], 0  ;;  %s125_s0 = inlined_call_operand.hbm [shape: f32[2,512], index: 0, kind: input, shape index: {}, may-alias: {0,1}]   ;;  %s126_s1 = inlined_call_operand.hbm [shape: f32[2,512], index: 1, kind: output, shape index: {}, may-alias: {0,1}]  }
   0x1   :  { %7 = vsyncpa [#allocation4], 0  ;;  %s89_s6 = smov [#allocation2]   ;;  %s41_s10 = scalar_lea.hbm %s125_s0, 128 }
   0x2   :  { %s14_s7 = sshll.u32 %s89_s6, 4  ;;  %p42_p0 = scmp.ne.s32.totalorder %s125_s0, %s41_s10  ;;  %s15_s7 = int_to_ptr.vmem [resolvable:$true] %s14_s7 }
   0x3   :  { %p45_p1 = scmp.lt.u32.totalorder %s41_s10, %s125_s0 }
   0x5   :  { %p47_p2 = pnand %p45_p1, %p42_p0 }
   0x7   :  { %50 = shalt.err (!%p47_p2)
}
   0x8   :  { %s51_s15 = scalar_lea.vmem %s15_s7, 128  ;;  %p56_p4 = scmp.lt.s32.totalorder %s15_s7, %s15_s7 }
   0x9   :  { %p52_p3 = scmp.ne.s32.totalorder %s15_s7, %s51_s15  ;;  %p57_p5 = scmp.lt.s32.totalorder %s51_s15, %s51_s15 }
   0xb   :  { %p58_p6 = por %p57_p5, %p56_p4 }
   0xd   :  { %p59_p7 = pnand %p58_p6, %p52_p3 }
   0xf   :  { %62 = shalt.err (!%p59_p7)
}
  0x10   :  { %17 = dma.hbm_to_vmem [thread:$0]  %s125_s0, 128, %s15_s7, [#allocation3]  }
  0x11   :  { %85 = dma.done.wait [#allocation3], 128  }
  0x12   :  { %86 = vsyncadd [#allocation3], 4294967168  ;;  %s90_s18 = smov [#allocation5]   ;;  %v21_v0 = vld [vmem:[#allocation2] sm:$0xff] }
  0x13   :  { %s30_s19 = sshll.u32 %s90_s18, 4  ;;  %v22_v1 = vmul.f32 8.333333, %v21_v0  ;;  %s31_s19 = int_to_ptr.vmem [resolvable:$true] %s30_s19 }
  0x14   :  { %s63_s20 = scalar_lea.vmem %s31_s19, 128  ;;  %p68_p9 = scmp.lt.s32.totalorder %s31_s19, %s31_s19 }
  0x15   :  { %23 = vst [vmem:[#allocation5] sm:$0xff] %v22_v1  ;;  %p64_p8 = scmp.ne.s32.totalorder %s31_s19, %s63_s20  ;;  %p69_p10 = scmp.lt.s32.totalorder %s63_s20, %s63_s20 }
  0x17   :  { %p70_p11 = por %p69_p10, %p68_p9 }
  0x19   :  { %p71_p12 = pnand %p70_p11, %p64_p8 }
  0x1b   :  { %74 = shalt.err (!%p71_p12)
}
  0x1c   :  { %s75_s23 = scalar_lea.hbm %s126_s1, 128 }
  0x1d   :  { %p76_p13 = scmp.ne.s32.totalorder %s126_s1, %s75_s23  ;;  %p79_p0 = scmp.lt.u32.totalorder %s75_s23, %s126_s1 }
  0x1f   :  { %p81_p1 = pnand %p79_p0, %p76_p13 }
  0x21   :  { %84 = shalt.err (!%p81_p1)
}
  0x22   :  { %33 = dma.vmem_to_hbm [thread:$0]  %s31_s19, 128, %s126_s1, [#allocation4]  }
  0x23   :  { %87 = dma.done.wait [#allocation4], 128  }
  0x24   :  { %88 = vsyncadd [#allocation4], 4294967168 }
  0x25   :  { %37 = vsyncpa [#allocation3], 1 }
  0x26   :  { %38 = vsyncpa [#allocation4], 1 }

</bundles_post_ra>
